<compile_context>
chip_gen: v6e
topology: v6e:2x2x1
jax: 0.10.0
libtpu: 0.0.40
codegen_flags: <defaults>
</compile_context>

<pallas_src>
import functools

import jax
import jax.numpy as jnp
from jax import lax
from jax.experimental import pallas as pl
from jax.experimental.pallas import tpu as pltpu

_LANES = 128
_NUM_CORES = 2                        # v7x megacore; sequential (harmless) on 1-TC chips
_MAX_BLOCK_BYTES = 2 * 1024 * 1024    # per-input block target (~2 MiB)
_VMEM_LIMIT_BYTES = 32 * 1024 * 1024  # 2 inputs x 2 buffers x 2 MiB + headroom


def _mask_loss_kernel(rows_valid, tile_rows, chunk, steps_per_core,
                      x_ref, y_ref, out_ref):
    c = pl.program_id(0)
    i = pl.program_id(1)

    # Output block (c, 0, 0) is resident across the "arbitrary" i axis, so it
    # doubles as the per-core accumulator: zero it on the first step per core.
    @pl.when(i == 0)
    def _():
        out_ref[...] = jnp.zeros_like(out_ref)

    blk = c * steps_per_core + i                # logical (unclamped) block index
    valid = rows_valid - blk * tile_rows        # #rows of this block inside the array

    row_iota = lax.broadcasted_iota(jnp.int32, (chunk, _LANES), 0)
    n_chunks = tile_rows // chunk

    def body(j, acc):
        r0 = pl.multiple_of(j * chunk, chunk)
        xs = x_ref[pl.ds(r0, chunk), :].astype(jnp.float32)
        ys = y_ref[pl.ds(r0, chunk), :].astype(jnp.float32)
        d = ys - xs
        contrib = jnp.abs(d) + d * d            # merged L1 + L2 partial sums
        # Mask rows past the end of the array (partial last block) and fully
        # out-of-range (clamped duplicate) blocks; garbage never propagates.
        m = (j * chunk + row_iota) < valid
        return acc + jnp.where(m, contrib, 0.0)

    unroll = 8 if n_chunks % 8 == 0 else (4 if n_chunks % 4 == 0 else
                                          (2 if n_chunks % 2 == 0 else 1))
    acc = lax.fori_loop(0, n_chunks, body,
                        jnp.zeros((chunk, _LANES), jnp.float32),
                        unroll=unroll)
    out_ref[0] += acc


def mask_loss(x, y):
    """L1Loss(y, x) + MSELoss(y, x), both with 'mean' reduction (PyTorch default)."""
    assert x.shape == y.shape, "Mask_Loss expects same-shaped inputs"
    if x.dtype != y.dtype:
        dt = jnp.result_type(x.dtype, y.dtype)
        x, y = x.astype(dt), y.astype(dt)
    n_total = int(x.size)
    assert n_total > 0
    itemsize = jnp.dtype(x.dtype).itemsize

    xf = x.reshape(-1)
    yf = y.reshape(-1)
    rem = n_total % _LANES
    if rem:
        # TODO(synk): stream the <128-element tail in-kernel (1-D tail block)
        # instead of this pad copy; only hit for non-128-multiple counts.
        pad = _LANES - rem
        xf = jnp.pad(xf, (0, pad))
        yf = jnp.pad(yf, (0, pad))
    rows = xf.size // _LANES
    x2 = xf.reshape(rows, _LANES)   # bitcast reshape (no HBM copy) on the aligned path
    y2 = yf.reshape(rows, _LANES)

    # Native packed sublane tile: (8,128) f32, (16,128) bf16/fp16, (32,128) 8-bit.
    sub = {4: 8, 2: 16, 1: 32}.get(itemsize, 8)

    max_tile_rows = max(sub, (_MAX_BLOCK_BYTES // (_LANES * itemsize)) // sub * sub)
    if rows >= sub:
        tile_rows = min(max_tile_rows, (rows // sub) * sub)
        chunk = sub
    else:
        tile_rows = rows            # block == full array dims (allowed)
        chunk = rows

    total_blocks = -(-rows // tile_rows)
    num_core_slots = min(_NUM_CORES, total_blocks)
    steps_per_core = -(-total_blocks // num_core_slots)

    def block_map(c, i):
        # Clamp so a fully out-of-range slot re-reads the last real block; its
        # contribution is zeroed by the in-kernel row mask.
        return (jnp.minimum(c * steps_per_core + i, total_blocks - 1), 0)

    kernel = functools.partial(_mask_loss_kernel, rows, tile_rows, chunk,
                               steps_per_core)

    partials = pl.pallas_call(
        kernel,
        out_shape=jax.ShapeDtypeStruct((num_core_slots, chunk, _LANES),
                                       jnp.float32),
        grid_spec=pltpu.PrefetchScalarGridSpec(
            num_scalar_prefetch=0,
            grid=(num_core_slots, steps_per_core),
            in_specs=[
                pl.BlockSpec((tile_rows, _LANES), block_map),
                pl.BlockSpec((tile_rows, _LANES), block_map),
            ],
            out_specs=pl.BlockSpec((1, chunk, _LANES), lambda c, i: (c, 0, 0)),
        ),
        compiler_params=pltpu.CompilerParams(
            dimension_semantics=("parallel", "arbitrary"),
            vmem_limit_bytes=_VMEM_LIMIT_BYTES,
        ),
        cost_estimate=pl.CostEstimate(
            flops=5 * n_total,
            transcendentals=0,
            bytes_accessed=2 * n_total * itemsize
            + num_core_slots * chunk * _LANES * 4,
        ),
    )(x2, y2)

    # Kernel produced sum(|y-x| + (y-x)^2); divide once by the true count.
    return jnp.sum(partials) * jnp.float32(1.0 / n_total)


def mask_loss_ref(x, y):
    d = y.astype(jnp.float32) - x.astype(jnp.float32)
    return jnp.mean(jnp.abs(d)) + jnp.mean(d * d)


if __name__ == "__main__":
    key = jax.random.PRNGKey(0)
    kx, ky = jax.random.split(key)
    # NCHW-style inputs, consistent with the module's typical use.
    x = jax.random.normal(kx, (2, 4, 16, 16), dtype=jnp.float32)
    y = jax.random.normal(ky, (2, 4, 16, 16), dtype=jnp.float32)

    loss = jax.block_until_ready(mask_loss(x, y))
    ref = jax.block_until_ready(mask_loss_ref(x, y))

    assert jnp.allclose(loss, ref, rtol=1e-5, atol=1e-5), (loss, ref)
    print("KERNEL_OK")
</pallas_src>

<mosaic_0001>
module attributes {stable_mosaic.version = 11 : i64} {
  func.func @_mask_loss_kernel(%arg0: i32, %arg1: i32, %arg2: memref<16x128xf32, #tpu.memory_space<vmem>>, %arg3: memref<16x128xf32, #tpu.memory_space<vmem>>, %arg4: memref<1x8x128xf32, #tpu.memory_space<vmem>>) attributes {dimension_semantics = [#tpu.dimension_semantics<parallel>, #tpu.dimension_semantics<arbitrary>], iteration_bounds = array<i64: 1, 1>, scalar_prefetch = 0 : i64, scratch_operands = 0 : i64, tpu.core_type = #tpu.core_type<tc>, window_params = [{transform_indices = @transform_0, window_bounds = array<i64: 16, 128>}, {transform_indices = @transform_1, window_bounds = array<i64: 16, 128>}, {transform_indices = @transform_2, window_bounds = array<i64: 1, 8, 128>}]} {
    %c0_i32 = arith.constant 0 : i32
    %0 = arith.cmpi eq, %arg1, %c0_i32 : i32
    %1 = arith.extui %0 : i1 to i32
    %c0_i32_0 = arith.constant 0 : i32
    %2 = arith.cmpi ne, %1, %c0_i32_0 : i32
    scf.if %2 {
      %cst_18 = arith.constant 0.000000e+00 : f32
      %51 = vector.broadcast %cst_18 : f32 to vector<1x8x128xf32>
      %c0_19 = arith.constant 0 : index
      %c0_20 = arith.constant 0 : index
      %c0_21 = arith.constant 0 : index
      %52 = vector.load %arg4[%c0_19, %c0_20, %c0_21] : memref<1x8x128xf32, #tpu.memory_space<vmem>>, vector<1x8x128xf32>
      tpu.vector_store %arg4[%c0_19, %c0_20, %c0_21], %51 {strides = array<i32>} : memref<1x8x128xf32, #tpu.memory_space<vmem>>, vector<1x8x128xf32>,
    } else {
    }
    %c1_i32 = arith.constant 1 : i32
    %3 = arith.muli %arg0, %c1_i32 : i32
    %4 = arith.addi %3, %arg1 : i32
    %c16_i32 = arith.constant 16 : i32
    %5 = arith.muli %4, %c16_i32 : i32
    %c16_i32_1 = arith.constant 16 : i32
    %6 = arith.subi %c16_i32_1, %5 : i32
    %7 = tpu.iota {dimensions = array<i32: 0>} : vector<8x128xi32>
    %cst = arith.constant 0.000000e+00 : f32
    %8 = vector.broadcast %cst : f32 to vector<8x128xf32>
    %c0_i32_2 = arith.constant 0 : i32
    %c8_i32 = arith.constant 8 : i32
    %9 = arith.muli %c0_i32_2, %c8_i32 : i32
    %10 = tpu.assume_multiple %9, 8 : i32
    %11 = arith.index_cast %10 : i32 to index
    %c0 = arith.constant 0 : index
    %12 = vector.load %arg2[%11, %c0] : memref<16x128xf32, #tpu.memory_space<vmem>>, vector<8x128xf32>
    %13 = arith.index_cast %10 : i32 to index
    %c0_3 = arith.constant 0 : index
    %14 = vector.load %arg3[%13, %c0_3] : memref<16x128xf32, #tpu.memory_space<vmem>>, vector<8x128xf32>
    %15 = arith.subf %14, %12 : vector<8x128xf32>
    %16 = math.absf %15 : vector<8x128xf32>
    %17 = arith.mulf %15, %15 : vector<8x128xf32>
    %18 = arith.addf %16, %17 : vector<8x128xf32>
    %c8_i32_4 = arith.constant 8 : i32
    %19 = arith.muli %c0_i32_2, %c8_i32_4 : i32
    %20 = vector.broadcast %19 : i32 to vector<8x128xi32>
    %21 = arith.addi %20, %7 : vector<8x128xi32>
    %22 = vector.broadcast %6 : i32 to vector<8x128xi32>
    %23 = arith.cmpi slt, %21, %22 : vector<8x128xi32>
    %cst_5 = arith.constant 0.000000e+00 : f32
    %24 = vector.broadcast %cst_5 : f32 to vector<8x128xf32>
    %25 = arith.select %23, %18, %24 : vector<8x128xi1>, vector<8x128xf32>
    %26 = arith.addf %8, %25 : vector<8x128xf32>
    %c1_i32_6 = arith.constant 1 : i32
    %c8_i32_7 = arith.constant 8 : i32
    %27 = arith.muli %c1_i32_6, %c8_i32_7 : i32
    %28 = tpu.assume_multiple %27, 8 : i32
    %29 = arith.index_cast %28 : i32 to index
    %c0_8 = arith.constant 0 : index
    %30 = vector.load %arg2[%29, %c0_8] : memref<16x128xf32, #tpu.memory_space<vmem>>, vector<8x128xf32>
    %31 = arith.index_cast %28 : i32 to index
    %c0_9 = arith.constant 0 : index
    %32 = vector.load %arg3[%31, %c0_9] : memref<16x128xf32, #tpu.memory_space<vmem>>, vector<8x128xf32>
    %33 = arith.subf %32, %30 : vector<8x128xf32>
    %34 = math.absf %33 : vector<8x128xf32>
    %35 = arith.mulf %33, %33 : vector<8x128xf32>
    %36 = arith.addf %34, %35 : vector<8x128xf32>
    %c8_i32_10 = arith.constant 8 : i32
    %37 = arith.muli %c1_i32_6, %c8_i32_10 : i32
    %38 = vector.broadcast %37 : i32 to vector<8x128xi32>
    %39 = arith.addi %38, %7 : vector<8x128xi32>
    %40 = vector.broadcast %6 : i32 to vector<8x128xi32>
    %41 = arith.cmpi slt, %39, %40 : vector<8x128xi32>
    %cst_11 = arith.constant 0.000000e+00 : f32
    %42 = vector.broadcast %cst_11 : f32 to vector<8x128xf32>
    %43 = arith.select %41, %36, %42 : vector<8x128xi1>, vector<8x128xf32>
    %44 = arith.addf %26, %43 : vector<8x128xf32>
    %c2_i32 = arith.constant 2 : i32
    %c0_12 = arith.constant 0 : index
    %c0_13 = arith.constant 0 : index
    %c0_14 = arith.constant 0 : index
    %45 = vector.load %arg4[%c0_12, %c0_13, %c0_14] : memref<1x8x128xf32, #tpu.memory_space<vmem>>, vector<1x8x128xf32>
    %46 = vector.shape_cast %45 : vector<1x8x128xf32> to vector<8x128xf32>
    %47 = arith.addf %46, %44 : vector<8x128xf32>
    %c0_15 = arith.constant 0 : index
    %c0_16 = arith.constant 0 : index
    %c0_17 = arith.constant 0 : index
    %48 = vector.load %arg4[%c0_15, %c0_16, %c0_17] : memref<1x8x128xf32, #tpu.memory_space<vmem>>, vector<1x8x128xf32>
    %49 = vector.shape_cast %48 : vector<1x8x128xf32> to vector<8x128xf32>
    %50 = vector.shape_cast %47 : vector<8x128xf32> to vector<1x8x128xf32>
    tpu.vector_store %arg4[%c0_15, %c0_16, %c0_17], %50 {strides = array<i32>} : memref<1x8x128xf32, #tpu.memory_space<vmem>>, vector<1x8x128xf32>,
    return
  }
  func.func @transform_0(%arg0: i32, %arg1: i32) -> (i32, i32) {
    %c1_i32 = arith.constant 1 : i32
    %0 = arith.muli %arg0, %c1_i32 : i32
    %1 = arith.addi %0, %arg1 : i32
    %c0_i32 = arith.constant 0 : i32
    %2 = arith.minsi %1, %c0_i32 : i32
    %c0_i32_0 = arith.constant 0 : i32
    %c0_i32_1 = arith.constant 0 : i32
    return %2, %c0_i32_0 : i32, i32
  }
  func.func @transform_1(%arg0: i32, %arg1: i32) -> (i32, i32) {
    %c1_i32 = arith.constant 1 : i32
    %0 = arith.muli %arg0, %c1_i32 : i32
    %1 = arith.addi %0, %arg1 : i32
    %c0_i32 = arith.constant 0 : i32
    %2 = arith.minsi %1, %c0_i32 : i32
    %c0_i32_0 = arith.constant 0 : i32
    %c0_i32_1 = arith.constant 0 : i32
    return %2, %c0_i32_0 : i32, i32
  }
  func.func @transform_2(%arg0: i32, %arg1: i32) -> (i32, i32, i32) {
    %c0_i32 = arith.constant 0 : i32
    %c0_i32_0 = arith.constant 0 : i32
    %c0_i32_1 = arith.constant 0 : i32
    return %arg0, %c0_i32, %c0_i32_0 : i32, i32, i32
  }
}

</mosaic_0001>

<bundles_post_ra>
// kernel: tpu_custom_call.1
= control target key start
LH: loop header
LB: loop body
LE: loop exit
PB: predicated region body
PF: predicated region fallthrough
CT: control target
= control target key end

     0   :  { %7 = vsyncpa [#allocation3], 0  ;;  %s216_s0 = inlined_call_operand.hbm [shape: f32[16,128], index: 0, kind: input, shape index: {}]   ;;  %s217_s1 = inlined_call_operand.hbm [shape: f32[16,128], index: 1, kind: input, shape index: {}]   ;;  %s218_s2 = inlined_call_operand.hbm [shape: f32[1,8,128], index: 2, kind: output, shape index: {}]  }
   0x1   :  { %8 = vsyncpa [#allocation6], 0 }
   0x2   :  { %9 = vsyncpa [#allocation4], 0  ;;  %s187_s9 = smov [#allocation2]  }
   0x3   :  { %s21_s10 = sshll.u32 %s187_s9, 4  ;;  %s22_s10 = int_to_ptr.vmem [resolvable:$true] %s21_s10 }
   0x4   :  { %s129_s11 = scalar_lea.vmem %s22_s10, 256  ;;  %p134_p1 = scmp.lt.s32.totalorder %s22_s10, %s22_s10 }
   0x5   :  { %p130_p0 = scmp.ne.s32.totalorder %s22_s10, %s129_s11  ;;  %p135_p2 = scmp.lt.s32.totalorder %s129_s11, %s129_s11 }
   0x7   :  { %p136_p3 = por %p135_p2, %p134_p1 }
   0x9   :  { %p137_p4 = pnand %p136_p3, %p130_p0 }
   0xb   :  { %140 = shalt.err (!%p137_p4)
}
   0xc   :  { %s188_s12 = smov 128   ;;  %s189_s13 = smov 8  }
   0xd   :  { %27 = dma.hbm_to_vmem [thread:$0]  %s216_s0, 256, %s22_s10, [#allocation3], %s188_s12, %s188_s12, %s189_s13  }
   0xe   :  { %s190_s16 = smov [#allocation5]  }
   0xf   :  { %s39_s17 = sshll.u32 %s190_s16, 4  ;;  %s40_s17 = int_to_ptr.vmem [resolvable:$true] %s39_s17 }
  0x10   :  { %s149_s18 = scalar_lea.vmem %s40_s17, 256  ;;  %p154_p6 = scmp.lt.s32.totalorder %s40_s17, %s40_s17 }
  0x11   :  { %p150_p5 = scmp.ne.s32.totalorder %s40_s17, %s149_s18  ;;  %p155_p7 = scmp.lt.s32.totalorder %s149_s18, %s149_s18 }
  0x13   :  { %p156_p8 = por %p155_p7, %p154_p6 }
  0x15   :  { %p157_p9 = pnand %p156_p8, %p150_p5 }
  0x17   :  { %160 = shalt.err (!%p157_p9)
}
  0x18   :  { %45 = dma.hbm_to_vmem [thread:$0]  %s217_s1, 256, %s40_s17, [#allocation6], %s188_s12, %s188_s12, %s189_s13  }
  0x19   :  { %181 = dma.done.wait [#allocation3], 256  }
  0x1a   :  { %182 = vsyncadd [#allocation3], 4294967040 }
  0x1b   :  { %183 = dma.done.wait [#allocation6], 256  }
  0x1c   :  { %184 = vsyncadd [#allocation6], 4294967040  ;;  %v70_v0 = vld [vmem:[#allocation2] sm:$0xff]  ;;  %v71_v1 = vld [vmem:[#allocation5] sm:$0xff]  ;;  %s191_s0 = smov [#allocation7]  }
  0x1d   :  { %v81_v2 = vld [vmem:[#allocation2 + $0x8] sm:$0xff]  ;;  %v72_v3 = vsub.f32 %v71_v1, %v70_v0  ;;  %v83_v4 = vld [vmem:[#allocation5 + $0x8] sm:$0xff]  ;;  %s101_s21 = sshll.u32 %s191_s0, 4  ;;  %s102_s21 = int_to_ptr.vmem [resolvable:$true] %s101_s21 }
  0x1e   :  { %v84_v5 = vsub.f32 %v83_v4, %v81_v2  ;;  %s161_s1 = scalar_lea.vmem %s102_s21, 128  ;;  %p166_p11 = scmp.lt.s32.totalorder %s102_s21, %s102_s21 }
  0x1f   :  { %v73_v6 = vand.u32 2147483647, %v72_v3  ;;  %v74_v7 = vmul.f32 %v72_v3, %v72_v3  ;;  %p162_p10 = scmp.ne.s32.totalorder %s102_s21, %s161_s1  ;;  %p167_p12 = scmp.lt.s32.totalorder %s161_s1, %s161_s1 }
  0x20   :  { %v85_v8 = vand.u32 2147483647, %v84_v5  ;;  %v86_v9 = vmul.f32 %v84_v5, %v84_v5 }
  0x21   :  { %v75_v10 = vadd.f32 %v74_v7, %v73_v6  ;;  %p168_p13 = por %p167_p12, %p166_p11 }
  0x22   :  { %v87_v11 = vadd.f32 %v86_v9, %v85_v8 }
  0x23   :  { %p169_p0 = pnand %p168_p13, %p162_p10 }
  0x24   :  { %v91_v12 = vadd.f32 %v87_v11, %v75_v10 }
  0x26   :  { %94 = vst [vmem:[#allocation7] sm:$0xff] %v91_v12 }
  0x27   :  { %172 = shalt.err (!%p169_p0)
}
  0x28   :  { %104 = dma.vmem_to_hbm [thread:$0]  %s102_s21, 128, %s218_s2, [#allocation4]  }
  0x29   :  { %185 = dma.done.wait [#allocation4], 128  }
  0x2a   :  { %186 = vsyncadd [#allocation4], 4294967168 }
  0x2b   :  { %108 = vsyncpa [#allocation3], 1 }
  0x2c   :  { %109 = vsyncpa [#allocation6], 1 }
  0x2d   :  { %110 = vsyncpa [#allocation4], 1 }

</bundles_post_ra>
